<compile_context>
chip_gen: v7x
topology: tpu7x:2x2x1
jax: 0.10.0
libtpu: 0.0.40
codegen_flags: <defaults>
</compile_context>

<pallas_src>
import functools

import numpy as np
import jax
import jax.numpy as jnp
from jax.experimental import pallas as pl
from jax.experimental.pallas import tpu as pltpu


# ---------------------------------------------------------------------------
# Mask construction (exact reproduction of MADE._build_masks, Eq 12/13)
# ---------------------------------------------------------------------------
def build_made_masks(num_input, num_output, num_hidden, num_layers=3):
    rng = np.random.RandomState(0)
    m = [np.arange(1, num_input + 1)]
    masks = []
    for i in range(1, num_layers + 1):
        if i == num_layers:
            mm = np.arange(1, num_input + 1)
            assert num_output % num_input == 0, "num_output must be multiple of num_input"
            m.append(np.hstack([mm for _ in range(num_output // num_input)]))
        else:
            m.append(rng.randint(1, num_input, size=num_hidden))
        if i == num_layers:
            mask = m[i][None, :] > m[i - 1][:, None]
        else:
            mask = m[i][None, :] >= m[i - 1][:, None]
        # torch stores mask.T -> shape (out_features, in_features)
        masks.append(np.ascontiguousarray(mask.astype(np.float32).T))
    return masks


# ---------------------------------------------------------------------------
# Pallas kernel: fused MADE forward for one batch tile.
# Inputs: xc = [x | context] in compute dtype; weights mask-folded, transposed
# to (in, out), hidden dims zero-padded; biases f32; f32 accumulation.
# ---------------------------------------------------------------------------
def made_kernel(xc_ref, w01_ref, b0_ref, w1_ref, b1_ref, w2_ref, b2_ref, out_ref):
    # Layer 0 (fused masked linear + conditional linear, one MXU launch)
    h = jnp.dot(xc_ref[...], w01_ref[...], preferred_element_type=jnp.float32)
    h = jnp.maximum(h + b0_ref[...], 0.0).astype(w1_ref.dtype)

    # Layer 1: masked linear + ReLU
    h = jnp.dot(h, w1_ref[...], preferred_element_type=jnp.float32)
    h = jnp.maximum(h + b1_ref[...], 0.0).astype(w2_ref.dtype)

    # Layer 2 (output): masked linear, narrow-N store (no dead lanes in HBM)
    o = jnp.dot(h, w2_ref[...], preferred_element_type=jnp.float32) + b2_ref[...]
    out_ref[...] = o.astype(out_ref.dtype)


# ---------------------------------------------------------------------------
# Host-side helpers
# ---------------------------------------------------------------------------
def _round_up(n, m):
    return ((n + m - 1) // m) * m


def _sublane(dtype):
    return {1: 32, 2: 16, 4: 8}[jnp.dtype(dtype).itemsize]


def prepare_made_params(params, masks, *, compute_dtype=jnp.bfloat16,
                        hidden_multiple=None):
    """One-time weight prep: fold masks, transpose to (in,out), pad hidden dim,
    stack layer-0 + conditional weights along K, cast to compute dtype."""
    w0, b0, cw, w1, b1, w2, b2 = params
    m0, m1, m2 = masks
    num_hidden = w0.shape[0]

    if hidden_multiple is None:
        # 256-wide MXU passes on v6e/v7x; 128 is enough when hidden <= 128
        # (and matches v5e's 4x128 MXU).
        hidden_multiple = 256 if num_hidden > 128 else 128
    Hp = _round_up(num_hidden, hidden_multiple)
    pad_h = Hp - num_hidden

    # Fused layer-0 weight: [ (m0*W0)^T ; Wc^T ]  -> (num_input+num_context, Hp)
    w01 = jnp.concatenate([jnp.transpose(m0 * w0), jnp.transpose(cw)], axis=0)
    w01 = jnp.pad(w01, ((0, 0), (0, pad_h)))
    w1t = jnp.pad(jnp.transpose(m1 * w1), ((0, pad_h), (0, pad_h)))
    w2t = jnp.pad(jnp.transpose(m2 * w2), ((0, pad_h), (0, 0)))   # narrow N kept
    b0p = jnp.pad(b0, ((0, 0), (0, pad_h)))
    b1p = jnp.pad(b1, ((0, 0), (0, pad_h)))
    b2p = b2

    # Weights feed the MXU in compute dtype; biases stay f32 (added post-acc).
    w01 = w01.astype(compute_dtype)
    w1t = w1t.astype(compute_dtype)
    w2t = w2t.astype(compute_dtype)
    return (w01, b0p, w1t, b1p, w2t, b2p)


def made_forward_prepared(x, context, prepped, *, compute_dtype=jnp.bfloat16,
                          out_dtype=jnp.float32, tb_max=512):
    """MADE forward with pre-prepared weights. Batch is tiled along the grid;
    weights stay resident in VMEM across all tiles."""
    w01, b0p, w1t, b1p, w2t, b2p = prepped
    B = x.shape[0]
    Kin = x.shape[1] + context.shape[1]
    num_output = w2t.shape[1]
    sub = _sublane(compute_dtype)

    # Batch tiling: minimize padded rows; guarantee >=2 tiles when the batch
    # is big enough so both v7x TensorCores get work (no-op on v5e/v6e).
    n_tiles = max(1, -(-B // tb_max))
    if n_tiles == 1 and B >= 4 * sub:
        n_tiles = 2
    tb = _round_up(-(-B // n_tiles), sub)
    Bp = tb * n_tiles

    # Narrow HBM layout: no 128-lane zero padding on the feature axes.
    xc = jnp.concatenate([x, context], axis=1).astype(compute_dtype)
    xc = jnp.pad(xc, ((0, Bp - B), (0, 0)))

    def full_spec(shape):
        nd = len(shape)
        return pl.BlockSpec(shape, lambda i, _nd=nd: (0,) * _nd)

    out_padded = pl.pallas_call(
        made_kernel,
        out_shape=jax.ShapeDtypeStruct((Bp, num_output), out_dtype),
        grid=(n_tiles,),
        in_specs=[
            pl.BlockSpec((tb, Kin), lambda i: (i, 0)),     # [x | ctx] tile
            full_spec(w01.shape), full_spec(b0p.shape),
            full_spec(w1t.shape), full_spec(b1p.shape),
            full_spec(w2t.shape), full_spec(b2p.shape),
        ],
        out_specs=pl.BlockSpec((tb, num_output), lambda i: (i, 0)),
        compiler_params=pltpu.CompilerParams(
            dimension_semantics=("parallel",),
        ),
    )(xc, w01, b0p, w1t, b1p, w2t, b2p)

    return out_padded[:B]


def made_forward(x, context, params, masks, *, compute_dtype=jnp.bfloat16,
                 out_dtype=jnp.float32, tb_max=512):
    """Convenience wrapper: prep + forward (prefer caching prepare_made_params
    and jitting made_forward_prepared in real use)."""
    prepped = prepare_made_params(params, masks, compute_dtype=compute_dtype)
    return made_forward_prepared(x, context, prepped,
                                 compute_dtype=compute_dtype,
                                 out_dtype=out_dtype, tb_max=tb_max)


# ---------------------------------------------------------------------------
# Pure-JAX reference (mirrors MaskedLinear / nn.Sequential forward)
# ---------------------------------------------------------------------------
def made_reference(x, context, params, masks):
    w0, b0, cw, w1, b1, w2, b2 = params
    m0, m1, m2 = masks
    h = x @ (m0 * w0).T + b0 + context @ cw.T
    h = jnp.maximum(h, 0.0)
    h = h @ (m1 * w1).T + b1
    h = jnp.maximum(h, 0.0)
    return h @ (m2 * w2).T + b2


# ---------------------------------------------------------------------------
# Deterministic parameter init (PyTorch nn.Linear-style uniform fan-in init)
# ---------------------------------------------------------------------------
def init_params(key, num_input, num_output, num_hidden, num_context):
    def linear_init(k, out_f, in_f, with_bias=True):
        kw, kb = jax.random.split(k)
        bound = 1.0 / np.sqrt(in_f)
        w = jax.random.uniform(kw, (out_f, in_f), jnp.float32, -bound, bound)
        if with_bias:
            b = jax.random.uniform(kb, (1, out_f), jnp.float32, -bound, bound)
            return w, b
        return w

    k0, kc, k1, k2 = jax.random.split(key, 4)
    w0, b0 = linear_init(k0, num_hidden, num_input)
    cw = linear_init(kc, num_hidden, num_context, with_bias=False)
    w1, b1 = linear_init(k1, num_hidden, num_hidden)
    w2, b2 = linear_init(k2, num_output, num_hidden)
    return (w0, b0, cw, w1, b1, w2, b2)


if __name__ == "__main__":
    # Small, MADE-consistent shapes: num_output must be a multiple of num_input.
    B = 16
    num_input, num_output, num_hidden, num_context = 8, 16, 32, 4

    masks_np = build_made_masks(num_input, num_output, num_hidden)
    masks = tuple(jnp.asarray(m) for m in masks_np)

    key = jax.random.PRNGKey(0)
    kx, kc, kp = jax.random.split(key, 3)
    x = jax.random.normal(kx, (B, num_input), jnp.float32)
    context = jax.random.normal(kc, (B, num_context), jnp.float32)
    params = init_params(kp, num_input, num_output, num_hidden, num_context)

    ref = np.asarray(made_reference(x, context, params, masks))

    # f32 MXU path: exact match to the reference.
    prepped_f32 = prepare_made_params(params, masks, compute_dtype=jnp.float32)
    fwd_f32 = jax.jit(functools.partial(
        made_forward_prepared, prepped=prepped_f32, compute_dtype=jnp.float32))
    out_f32 = jax.block_until_ready(fwd_f32(x, context))
    assert out_f32.shape == (B, num_output)
    np.testing.assert_allclose(np.asarray(out_f32), ref, rtol=1e-5, atol=1e-5)

    # Default bf16 MXU path (f32 accumulation): loose tolerance.
    prepped_bf16 = prepare_made_params(params, masks, compute_dtype=jnp.bfloat16)
    fwd_bf16 = jax.jit(functools.partial(
        made_forward_prepared, prepped=prepped_bf16, compute_dtype=jnp.bfloat16))
    out_bf16 = jax.block_until_ready(fwd_bf16(x, context))
    assert out_bf16.shape == (B, num_output)
    np.testing.assert_allclose(np.asarray(out_bf16), ref, rtol=1e-1, atol=1e-1)

    print("KERNEL_OK")
</pallas_src>

<mosaic_0001>
module attributes {stable_mosaic.version = 11 : i64} {
  func.func @made_kernel(%arg0: i32, %arg1: memref<16x12xf32, #tpu.memory_space<vmem>>, %arg2: memref<12x128xf32, #tpu.memory_space<vmem>>, %arg3: memref<1x128xf32, #tpu.memory_space<vmem>>, %arg4: memref<128x128xf32, #tpu.memory_space<vmem>>, %arg5: memref<1x128xf32, #tpu.memory_space<vmem>>, %arg6: memref<128x16xf32, #tpu.memory_space<vmem>>, %arg7: memref<1x16xf32, #tpu.memory_space<vmem>>, %arg8: memref<16x16xf32, #tpu.memory_space<vmem>>) attributes {dimension_semantics = [#tpu.dimension_semantics<parallel>], iteration_bounds = array<i64: 1>, scalar_prefetch = 0 : i64, scratch_operands = 0 : i64, tpu.core_type = #tpu.core_type<tc>, window_params = [{transform_indices = @transform_0, window_bounds = array<i64: 16, 12>}, {pipeline_mode = #tpu.pipeline_mode<synchronous>, transform_indices = @transform_1, window_bounds = array<i64: 12, 128>}, {pipeline_mode = #tpu.pipeline_mode<synchronous>, transform_indices = @transform_2, window_bounds = array<i64: 1, 128>}, {pipeline_mode = #tpu.pipeline_mode<synchronous>, transform_indices = @transform_3, window_bounds = array<i64: 128, 128>}, {pipeline_mode = #tpu.pipeline_mode<synchronous>, transform_indices = @transform_4, window_bounds = array<i64: 1, 128>}, {pipeline_mode = #tpu.pipeline_mode<synchronous>, transform_indices = @transform_5, window_bounds = array<i64: 128, 16>}, {pipeline_mode = #tpu.pipeline_mode<synchronous>, transform_indices = @transform_6, window_bounds = array<i64: 1, 16>}, {transform_indices = @transform_7, window_bounds = array<i64: 16, 16>}]} {
    %c0 = arith.constant 0 : index
    %c0_0 = arith.constant 0 : index
    %0 = vector.load %arg1[%c0, %c0_0] : memref<16x12xf32, #tpu.memory_space<vmem>>, vector<16x12xf32>
    %c0_1 = arith.constant 0 : index
    %c0_2 = arith.constant 0 : index
    %1 = vector.load %arg2[%c0_1, %c0_2] : memref<12x128xf32, #tpu.memory_space<vmem>>, vector<12x128xf32>
    %cst = arith.constant dense<0.000000e+00> : vector<16x128xf32>
    %2 = tpu.matmul %0, %1, %cst {dimension_numbers = #tpu.dot_dimension_numbers<[1], [0], [0], [1], [0, 0, 1, 1], [], []>} : vector<16x12xf32>, vector<12x128xf32>, vector<16x128xf32> -> vector<16x128xf32>
    %c0_3 = arith.constant 0 : index
    %c0_4 = arith.constant 0 : index
    %3 = vector.load %arg3[%c0_3, %c0_4] : memref<1x128xf32, #tpu.memory_space<vmem>>, vector<1x128xf32>
    %4 = vector.broadcast %3 : vector<1x128xf32> to vector<16x128xf32>
    %5 = arith.addf %2, %4 : vector<16x128xf32>
    %cst_5 = arith.constant 0.000000e+00 : f32
    %6 = vector.broadcast %cst_5 : f32 to vector<16x128xf32>
    %7 = arith.maximumf %5, %6 : vector<16x128xf32>
    %c0_6 = arith.constant 0 : index
    %c0_7 = arith.constant 0 : index
    %8 = vector.load %arg4[%c0_6, %c0_7] : memref<128x128xf32, #tpu.memory_space<vmem>>, vector<128x128xf32>
    %cst_8 = arith.constant dense<0.000000e+00> : vector<16x128xf32>
    %9 = tpu.matmul %7, %8, %cst_8 {dimension_numbers = #tpu.dot_dimension_numbers<[1], [0], [0], [1], [0, 0, 1, 1], [], []>} : vector<16x128xf32>, vector<128x128xf32>, vector<16x128xf32> -> vector<16x128xf32>
    %c0_9 = arith.constant 0 : index
    %c0_10 = arith.constant 0 : index
    %10 = vector.load %arg5[%c0_9, %c0_10] : memref<1x128xf32, #tpu.memory_space<vmem>>, vector<1x128xf32>
    %11 = vector.broadcast %10 : vector<1x128xf32> to vector<16x128xf32>
    %12 = arith.addf %9, %11 : vector<16x128xf32>
    %cst_11 = arith.constant 0.000000e+00 : f32
    %13 = vector.broadcast %cst_11 : f32 to vector<16x128xf32>
    %14 = arith.maximumf %12, %13 : vector<16x128xf32>
    %c0_12 = arith.constant 0 : index
    %c0_13 = arith.constant 0 : index
    %15 = vector.load %arg6[%c0_12, %c0_13] : memref<128x16xf32, #tpu.memory_space<vmem>>, vector<128x16xf32>
    %cst_14 = arith.constant dense<0.000000e+00> : vector<16x16xf32>
    %16 = tpu.matmul %14, %15, %cst_14 {dimension_numbers = #tpu.dot_dimension_numbers<[1], [0], [0], [1], [0, 0, 1, 1], [], []>} : vector<16x128xf32>, vector<128x16xf32>, vector<16x16xf32> -> vector<16x16xf32>
    %c0_15 = arith.constant 0 : index
    %c0_16 = arith.constant 0 : index
    %17 = vector.load %arg7[%c0_15, %c0_16] : memref<1x16xf32, #tpu.memory_space<vmem>>, vector<1x16xf32>
    %18 = vector.broadcast %17 : vector<1x16xf32> to vector<16x16xf32>
    %19 = arith.addf %16, %18 : vector<16x16xf32>
    %c0_17 = arith.constant 0 : index
    %c0_18 = arith.constant 0 : index
    %20 = vector.load %arg8[%c0_17, %c0_18] : memref<16x16xf32, #tpu.memory_space<vmem>>, vector<16x16xf32>
    tpu.vector_store %arg8[%c0_17, %c0_18], %19 {strides = array<i32>} : memref<16x16xf32, #tpu.memory_space<vmem>>, vector<16x16xf32>,
    return
  }
  func.func @transform_0(%arg0: i32) -> (i32, i32) {
    %c0_i32 = arith.constant 0 : i32
    %c0_i32_0 = arith.constant 0 : i32
    return %arg0, %c0_i32 : i32, i32
  }
  func.func @transform_1(%arg0: i32) -> (i32, i32) {
    %c0_i32 = arith.constant 0 : i32
    %c0_i32_0 = arith.constant 0 : i32
    %c0_i32_1 = arith.constant 0 : i32
    return %c0_i32, %c0_i32_0 : i32, i32
  }
  func.func @transform_2(%arg0: i32) -> (i32, i32) {
    %c0_i32 = arith.constant 0 : i32
    %c0_i32_0 = arith.constant 0 : i32
    %c0_i32_1 = arith.constant 0 : i32
    return %c0_i32, %c0_i32_0 : i32, i32
  }
  func.func @transform_3(%arg0: i32) -> (i32, i32) {
    %c0_i32 = arith.constant 0 : i32
    %c0_i32_0 = arith.constant 0 : i32
    %c0_i32_1 = arith.constant 0 : i32
    return %c0_i32, %c0_i32_0 : i32, i32
  }
  func.func @transform_4(%arg0: i32) -> (i32, i32) {
    %c0_i32 = arith.constant 0 : i32
    %c0_i32_0 = arith.constant 0 : i32
    %c0_i32_1 = arith.constant 0 : i32
    return %c0_i32, %c0_i32_0 : i32, i32
  }
  func.func @transform_5(%arg0: i32) -> (i32, i32) {
    %c0_i32 = arith.constant 0 : i32
    %c0_i32_0 = arith.constant 0 : i32
    %c0_i32_1 = arith.constant 0 : i32
    return %c0_i32, %c0_i32_0 : i32, i32
  }
  func.func @transform_6(%arg0: i32) -> (i32, i32) {
    %c0_i32 = arith.constant 0 : i32
    %c0_i32_0 = arith.constant 0 : i32
    %c0_i32_1 = arith.constant 0 : i32
    return %c0_i32, %c0_i32_0 : i32, i32
  }
  func.func @transform_7(%arg0: i32) -> (i32, i32) {
    %c0_i32 = arith.constant 0 : i32
    %c0_i32_0 = arith.constant 0 : i32
    return %arg0, %c0_i32 : i32, i32
  }
}

</mosaic_0001>

<bundles_post_ra>
// kernel: made_forward_prepared.1
= control target key start
LH: loop header
LB: loop body
LE: loop exit
PB: predicated region body
PF: predicated region fallthrough
CT: control target
= control target key end

     0   :  { %12 = vsyncpa [#allocation3], 0  ;;  %s758_s0 = inlined_call_operand.vmem [shape: f32[16,12], index: 0, kind: input, shape index: {}]   ;;  %s759_s1 = inlined_call_operand.vmem [shape: f32[12,128], index: 1, kind: input, shape index: {}]   ;;  %s760_s2 = inlined_call_operand.vmem [shape: f32[1,128], index: 2, kind: input, shape index: {}]   ;;  %s761_s3 = inlined_call_operand.hbm [shape: f32[128,128], index: 3, kind: input, shape index: {}]   ;;  %s762_s4 = inlined_call_operand.vmem [shape: f32[1,128], index: 4, kind: input, shape index: {}]   ;;  %s763_s5 = inlined_call_operand.hbm [shape: f32[128,16], index: 5, kind: input, shape index: {}]   ;;  %s764_s6 = inlined_call_operand.vmem [shape: f32[1,16], index: 6, kind: input, shape index: {}]   ;;  %s765_s7 = inlined_call_operand.hbm [shape: f32[16,16], index: 7, kind: output, shape index: {}]  }
   0x1   :  { %13 = vsyncpa [#allocation6], 0 }
   0x2   :  { %14 = vsyncpa [#allocation4], 0  ;;  %s644_s24 = smov [#allocation2]   ;;  %s572_s28 = scalar_lea.hbm %s761_s3, 2048 }
   0x3   :  { %s26_s25 = sshll.u32 %s644_s24, 4  ;;  %p573_p0 = scmp.ne.s32.totalorder %s761_s3, %s572_s28  ;;  %s27_s25 = int_to_ptr.vmem [resolvable:$true] %s26_s25 }
   0x4   :  { %p576_p1 = scmp.lt.u32.totalorder %s572_s28, %s761_s3 }
   0x6   :  { %p578_p2 = pnand %p576_p1, %p573_p0 }
   0x8   :  { %581 = shalt.err (!%p578_p2)
}
   0x9   :  { %s582_s10 = scalar_lea.vmem %s27_s25, 2048  ;;  %p587_p4 = scmp.lt.s32.totalorder %s27_s25, %s27_s25 }
   0xa   :  { %p583_p3 = scmp.ne.s32.totalorder %s27_s25, %s582_s10  ;;  %p588_p5 = scmp.lt.s32.totalorder %s582_s10, %s582_s10 }
   0xc   :  { %p589_p6 = por %p588_p5, %p587_p4 }
   0xe   :  { %p590_p7 = pnand %p589_p6, %p583_p3 }
  0x10   :  { %593 = shalt.err (!%p590_p7)
}
  0x11   :  { %s645_s11 = smov 128   ;;  %s646_s12 = smov 8  }
  0x12   :  { %32 = dma.hbm_to_vmem [thread:$0]  %s761_s3, 2048, %s27_s25, [#allocation3], %s645_s11, %s645_s11, %s646_s12  }
  0x13   :  { %s647_s15 = smov [#allocation5]   ;;  %s594_s19 = scalar_lea.hbm %s763_s5, 2048 }
  0x14   :  { %s40_s16 = sshll.u32 %s647_s15, 4  ;;  %p595_p8 = scmp.ne.s32.totalorder %s763_s5, %s594_s19  ;;  %s41_s16 = int_to_ptr.vmem [resolvable:$true] %s40_s16 }
  0x15   :  { %p598_p9 = scmp.lt.u32.totalorder %s594_s19, %s763_s5 }
  0x17   :  { %p600_p10 = pnand %p598_p9, %p595_p8 }
  0x19   :  { %603 = shalt.err (!%p600_p10)
}
  0x1a   :  { %s604_s24 = scalar_lea.vmem %s41_s16, 2048  ;;  %p609_p12 = scmp.lt.s32.totalorder %s41_s16, %s41_s16 }
  0x1b   :  { %p605_p11 = scmp.ne.s32.totalorder %s41_s16, %s604_s24  ;;  %p610_p13 = scmp.lt.s32.totalorder %s604_s24, %s604_s24 }
  0x1d   :  { %p611_p0 = por %p610_p13, %p609_p12 }
  0x1f   :  { %p612_p1 = pnand %p611_p0, %p605_p11 }
  0x21   :  { %615 = shalt.err (!%p612_p1)
}
  0x22   :  { %46 = dma.hbm_to_vmem [thread:$0]  %s763_s5, 2048, %s41_s16, [#allocation6], %s645_s11, %s645_s11, %s646_s12  }
  0x23   :  { %638 = dma.done.wait [#allocation3], 2048  }
  0x24   :  { %639 = vsyncadd [#allocation3], 4294965248 }
  0x25   :  { %640 = dma.done.wait [#allocation6], 2048  }
  0x26   :  { %641 = vsyncadd [#allocation6], 4294965248  ;;  %vm73_vm0 = vcmask 1043456   ;;  %vm66_vm1 = vcmask 97280   ;;  %vm648_vm2 = vmmov 1   ;;  %v57_v0 = vld [vmem:[%s759_s1] sm:$0xff] }
  0x27   :  { %vm497_vm3 = vmpackc.low %vm73_vm0, %vm648_vm2  ;;  %v58_v1 = vld [vmem:[%s759_s1 + $0x8] sm:$0xf]  ;;  %v55_v2 = vld [vmem:[%s758_s0] sm:$0xff]  ;;  %s649_s15 = smov [#allocation7]   ;;  %vm352_vm4 = vcmask 130048  }
  0x28   :  { %v496_v3 = vpack.c.bf16 %v58_v1, %v57_v0  ;;  %423 = vmatprep.mubr.msk.f32.mxu0 %vm66_vm1, %v55_v2  ;;  %v154_v4 = vld [vmem:[#allocation2] sm:$0xff]  ;;  %v155_v5 = vld [vmem:[#allocation2 + $0x8] sm:$0xff]  ;;  %v156_v7 = vld [vmem:[#allocation2 + $0x10] sm:$0xff]  ;;  %s360_s16 = sshll.u32 %s649_s15, 4  ;;  %s361_s16 = int_to_ptr.vmem [resolvable:$true] %s360_s16 }
  0x29   :  { %v502_v6 = vpack.c.bf16 %v155_v5, %v154_v4  ;;  %v157_v8 = vld [vmem:[#allocation2 + $0x18] sm:$0xff]  ;;  %v158_v10 = vld [vmem:[#allocation2 + $0x20] sm:$0xff]  ;;  %v159_v11 = vld [vmem:[#allocation2 + $0x28] sm:$0xff]  ;;  %p621_p3 = scmp.lt.s32.totalorder %s361_s16, %s361_s16 }
  0x2a   :  { %498 = vmatprep.subr.msk.bf16.mxu0 %vm497_vm3, %v496_v3  ;;  %v506_v9 = vpack.c.bf16 %v157_v8, %v156_v7  ;;  %v56_v12 = vld [vmem:[%s758_s0 + $0x8] sm:$0xff]  ;;  %v510_v13 = vpack.c.bf16 %v159_v11, %v158_v10  ;;  %v160_v14 = vld [vmem:[#allocation2 + $0x30] sm:$0xff]  ;;  %v161_v15 = vld [vmem:[#allocation2 + $0x38] sm:$0xff] }
  0x2b   :  { %501 = vmatpush3.bf16.msk.msra.mxu0 %vm497_vm3, %v496_v3  ;;  %503 = vmatprep.subr.bf16.mxu1 %v502_v6  ;;  %v514_v16 = vpack.c.bf16 %v161_v15, %v160_v14  ;;  %v162_v17 = vld [vmem:[#allocation2 + $0x40] sm:$0xff]  ;;  %v163_v18 = vld [vmem:[#allocation2 + $0x48] sm:$0xff]  ;;  %v164_v20 = vld [vmem:[#allocation2 + $0x50] sm:$0xff] }
  0x2c   :  { %505 = vmatpush3.bf16.msra.mxu1 %v502_v6  ;;  %v518_v19 = vpack.c.bf16 %v163_v18, %v162_v17  ;;  %v165_v21 = vld [vmem:[#allocation2 + $0x58] sm:$0xff]  ;;  %v166_v23 = vld [vmem:[#allocation2 + $0x60] sm:$0xff]  ;;  %v167_v24 = vld [vmem:[#allocation2 + $0x68] sm:$0xff] }
  0x2d   :  { %507 = vmatprep.subr.bf16.mxu1 %v506_v9  ;;  %v522_v22 = vpack.c.bf16 %v165_v21, %v164_v20  ;;  %v526_v25 = vpack.c.bf16 %v167_v24, %v166_v23  ;;  %v168_v26 = vld [vmem:[#allocation2 + $0x70] sm:$0xff]  ;;  %v169_v27 = vld [vmem:[#allocation2 + $0x78] sm:$0xff]  ;;  %v254_v29 = vld [vmem:[#allocation5] sm:$0xff] }
  0x2e   :  { %424 = vmatmul.mubr.msk.f32.vlgmr.msra.gmra.mrb[0].mxu0 %vm66_vm1, %v56_v12  ;;  %v530_v28 = vpack.c.bf16 %v169_v27, %v168_v26  ;;  %v255_v30 = vld [vmem:[#allocation5 + $0x8] sm:$0xff]  ;;  %v256_v31 = vld [vmem:[#allocation5 + $0x10] sm:$0xff]  ;;  %v257_v33 = vld [vmem:[#allocation5 + $0x18] sm:$0xff] }
  0x2f   :  { %v534_v32 = vpack.c.bf16 %v255_v30, %v254_v29  ;;  %v538_v34 = vpack.c.bf16 %v257_v33, %v256_v31  ;;  %v258_v35 = vld [vmem:[#allocation5 + $0x20] sm:$0xff]  ;;  %v259_v36 = vld [vmem:[#allocation5 + $0x28] sm:$0xff]  ;;  %v260_v38 = vld [vmem:[#allocation5 + $0x30] sm:$0xff] }
  0x30   :  { %509 = vmatpush3.bf16.msra.mxu1 %v506_v9  ;;  %v542_v37 = vpack.c.bf16 %v259_v36, %v258_v35  ;;  %v261_v39 = vld [vmem:[#allocation5 + $0x38] sm:$0xff]  ;;  %v262_v41 = vld [vmem:[#allocation5 + $0x40] sm:$0xff]  ;;  %v263_v42 = vld [vmem:[#allocation5 + $0x48] sm:$0xff] }
  0x31   :  { %511 = vmatprep.subr.bf16.mxu1 %v510_v13  ;;  %535 = vmatprep.subr.bf16.mxu0 %v534_v32  ;;  %v546_v40 = vpack.c.bf16 %v261_v39, %v260_v38  ;;  %v550_v43 = vpack.c.bf16 %v263_v42, %v262_v41  ;;  %v264_v44 = vld [vmem:[#allocation5 + $0x50] sm:$0xff]  ;;  %v265_v45 = vld [vmem:[#allocation5 + $0x58] sm:$0xff]  ;;  %v266_v47 = vld [vmem:[#allocation5 + $0x60] sm:$0xff] }
  0x32   :  { %537 = vmatpush3.bf16.msra.mxu0 %v534_v32  ;;  %v554_v46 = vpack.c.bf16 %v265_v45, %v264_v44  ;;  %v267_v48 = vld [vmem:[#allocation5 + $0x68] sm:$0xff]  ;;  %v373_v50 = vld [vmem:[%s760_s2] ss:$0 sm:$0xff]  ;;  %v268_v57 = vld [vmem:[#allocation5 + $0x70] sm:$0xff] }
  0x33   :  { %539 = vmatprep.subr.bf16.mxu0 %v538_v34  ;;  %v558_v49 = vpack.c.bf16 %v267_v48, %v266_v47  ;;  %v269_v58 = vld [vmem:[#allocation5 + $0x78] sm:$0xff]  ;;  %v377_v60 = vld [vmem:[%s762_s4] ss:$0 sm:$0xff]  ;;  %s616_s4 = scalar_lea.vmem %s361_s16, 256 }
  0x34   :  { %513 = vmatpush3.bf16.msra.mxu1 %v510_v13  ;;  %v562_v59 = vpack.c.bf16 %v269_v58, %v268_v57  ;;  %v378_v3 = vld [vmem:[%s764_s6] ss:$0 sm:$0xff]  ;;  %p617_p2 = scmp.ne.s32.totalorder %s361_s16, %s616_s4  ;;  %p622_p4 = scmp.lt.s32.totalorder %s616_s4, %s616_s4 }
  0x35   :  { %515 = vmatprep.subr.bf16.mxu1 %v514_v16 }
  0x36   :  { %541 = vmatpush3.bf16.msra.mxu0 %v538_v34  ;;  %p623_p5 = por %p622_p4, %p621_p3 }
  0x37   :  { %543 = vmatprep.subr.bf16.mxu0 %v542_v37 }
  0x38   :  { %517 = vmatpush3.bf16.msra.mxu1 %v514_v16  ;;  %p624_p6 = pnand %p623_p5, %p617_p2 }
  0x39   :  { %519 = vmatprep.subr.bf16.mxu1 %v518_v19 }
  0x3a   :  { %545 = vmatpush3.bf16.msra.mxu0 %v542_v37 }
  0x3b   :  { %547 = vmatprep.subr.bf16.mxu0 %v546_v40 }
  0x3c   :  { %521 = vmatpush3.bf16.msra.mxu1 %v518_v19 }
  0x3d   :  { %523 = vmatprep.subr.bf16.mxu1 %v522_v22 }
  0x3e   :  { %549 = vmatpush3.bf16.msra.mxu0 %v546_v40 }
  0x3f   :  { %551 = vmatprep.subr.bf16.mxu0 %v550_v43 }
  0x40   :  { %525 = vmatpush3.bf16.msra.mxu1 %v522_v22 }
  0x41   :  { %527 = vmatprep.subr.bf16.mxu1 %v526_v25 }
  0x42   :  { %553 = vmatpush3.bf16.msra.mxu0 %v550_v43 }
  0x43   :  { %555 = vmatprep.subr.bf16.mxu0 %v554_v46 }
  0x44   :  { %529 = vmatpush3.bf16.msra.mxu1 %v526_v25 }
  0x45   :  { %531 = vmatprep.subr.bf16.mxu1 %v530_v28 }
  0x46   :  { %557 = vmatpush3.bf16.msra.mxu0 %v554_v46 }
  0x47   :  { %559 = vmatprep.subr.bf16.mxu0 %v558_v49 }
  0x48   :  { %533 = vmatpush3.bf16.msra.mxu1 %v530_v28 }
  0x4a   :  { %561 = vmatpush3.bf16.msra.mxu0 %v558_v49 }
  0x4b   :  { %563 = vmatprep.subr.bf16.mxu0 %v562_v59 }
  0x4e   :  { %565 = vmatpush3.bf16.msra.mxu0 %v562_v59 }
 0x101   :  { %v425_v51 = vpop.f32.mrb[0].mxu0 }
 0x102   :  { %v149_v52 = vadd.f32 %v425_v51, %v373_v50  ;;  %v143_v53 = vpop.f32.mrb[1].mxu0 }
 0x103   :  { %v144_v54 = vadd.f32 %v373_v50, %v143_v53 }
 0x104   :  { %v153_v56 = vmax.f32 %v149_v52, 0.0 }
 0x105   :  { %v152_v55 = vmax.f32 %v144_v54, 0.0 }
 0x107   :  { %458 = vmatprep.mubr.f32.mxu1 %v152_v55 }
 0x108   :  { %459 = vmatmul.mubr.f32.vlgmr.msra.gmra.mrb[0].mxu1 %v153_v56 }
 0x1db   :  { %v460_v61 = vpop.f32.mrb[0].mxu1 }
 0x1dc   :  { %v249_v62 = vadd.f32 %v460_v61, %v377_v60  ;;  %v243_v63 = vpop.f32.mrb[1].mxu1 }
 0x1dd   :  { %v244_v0 = vadd.f32 %v377_v60, %v243_v63 }
 0x1de   :  { %v253_v2 = vmax.f32 %v249_v62, 0.0 }
 0x1df   :  { %v252_v1 = vmax.f32 %v244_v0, 0.0 }
 0x1e1   :  { %493 = vmatprep.mubr.f32.mxu0 %v252_v1 }
 0x1e2   :  { %494 = vmatmul.mubr.f32.vlgmr.msra.gmra.mrb[2].mxu0 %v253_v2 }
 0x2b5   :  { %v495_v4 = vpop.f32.mrb[2].mxu0 }
 0x2b6   :  { %v349_v5 = vadd.f32 %v495_v4, %v378_v3  ;;  %v343_v6 = vpop.f32.mrb[3].mxu0 }
 0x2b7   :  { %v344_v7 = vadd.f32 %v378_v3, %v343_v6 }
 0x2b8   :  { %354 = vst.msk [vmem:[#allocation7 + $0x8] sm:$0xff] %vm352_vm4, %v349_v5 }
 0x2b9   :  { %353 = vst.msk [vmem:[#allocation7] sm:$0xff] %vm352_vm4, %v344_v7 }
 0x2ba   :  { %627 = shalt.err (!%p624_p6)
}
 0x2bb   :  { %s628_s6 = scalar_lea.hbm %s765_s7, 256 }
 0x2bc   :  { %p629_p7 = scmp.ne.s32.totalorder %s765_s7, %s628_s6  ;;  %p632_p8 = scmp.lt.u32.totalorder %s628_s6, %s765_s7 }
 0x2be   :  { %p634_p9 = pnand %p632_p8, %p629_p7 }
 0x2c0   :  { %637 = shalt.err (!%p634_p9)
}
 0x2c1   :  { %366 = dma.vmem_to_hbm [thread:$0]  %s361_s16, 256, %s765_s7, [#allocation4], %s645_s11, %s645_s11, %s646_s12  }
 0x2c2   :  { %642 = dma.done.wait [#allocation4], 256  }
 0x2c3   :  { %643 = vsyncadd [#allocation4], 4294967040 }
 0x2c4   :  { %370 = vsyncpa [#allocation3], 1 }
 0x2c5   :  { %371 = vsyncpa [#allocation6], 1 }
 0x2c6   :  { %372 = vsyncpa [#allocation4], 1 }

</bundles_post_ra>
